<compile_context>
chip_gen: v5e
topology: v5e:2x2
jax: 0.10.0
libtpu: 0.0.40
codegen_flags: <defaults>
</compile_context>

<pallas_src>
import functools
import math

import numpy as np
import jax
import jax.numpy as jnp
from jax.experimental import pallas as pl
from jax.experimental.pallas import tpu as pltpu

_PARALLEL = pltpu.CompilerParams(dimension_semantics=("parallel",))


# ----------------------------------------------------------------------------------
# In-kernel helpers
# ----------------------------------------------------------------------------------


def _sum_last2(v):
    """Reduce the last two dims (lane then sublane), keepdims."""
    return jnp.sum(jnp.sum(v, axis=-1, keepdims=True), axis=-2, keepdims=True)


def _group_normalize(x, mask_ref, groups, eps):
    """GroupNorm statistics via per-group mask reductions (VPU only).

    x: (..., T, C); mask_ref[g] broadcasts against x with ones on group-g channels.
    Returns (x - mean) * rsqrt(var + eps).
    """
    cg = x.shape[-1] // groups
    inv_n = 1.0 / float(cg * x.shape[-2])
    mean_c = None
    for g in range(groups):
        mg = mask_ref[g]
        sg = _sum_last2(x * mg) * inv_n
        term = sg * mg
        mean_c = term if mean_c is None else mean_c + term
    xc = x - mean_c
    var_c = None
    for g in range(groups):
        mg = mask_ref[g]
        vg = _sum_last2(xc * xc * mg) * inv_n
        term = vg * mg
        var_c = term if var_c is None else var_c + term
    return xc * jax.lax.rsqrt(var_c + eps)


# ----------------------------------------------------------------------------------
# Pallas kernels
# ----------------------------------------------------------------------------------


def _conv3x3_kernel(x_ref, w_ref, b_ref, o_ref, *, W, pre_silu):
    """3x3 'same' conv over a tile of TB flattened padded images.

    x_ref: (R, Cin) with R = TB*(H+2)*(W+2) flattened padded rows (row-major over (n, y, x)).
    w_ref: (3, 3, Cin, Cout);  b_ref: (1, Cout);  o_ref: (R, Cout).
    Valid outputs end up at rows n*(H+2)*(W+2) + y*(W+2) + x (y < H, x < W); the remaining
    rows carry wrap-around garbage and are discarded by the wrapper.
    """
    R = o_ref.shape[0]
    Cout = o_ref.shape[1]
    Wp = W + 2
    L = R - 2 * Wp - 2

    x = x_ref[...]
    if pre_silu:
        x = x * jax.nn.sigmoid(x)

    acc = jnp.zeros((L, Cout), jnp.float32)
    for dy in range(3):
        for dx in range(3):
            off = dy * Wp + dx
            xs = x[off:off + L, :].astype(jnp.bfloat16)
            wk = w_ref[dy, dx].astype(jnp.bfloat16)
            acc = acc + jnp.dot(xs, wk, preferred_element_type=jnp.float32)
    o_ref[0:L, :] = acc + b_ref[...]


def _gn_kernel(x_ref, g_ref, b_ref, mask_ref, o_ref, *, groups, eps, silu):
    """GroupNorm (affine) -> optional SiLU over the full batch.  x_ref: (B, T, C)."""
    x = x_ref[...]
    y = _group_normalize(x, mask_ref, groups, eps) * g_ref[...] + b_ref[...]
    if silu:
        y = y * jax.nn.sigmoid(y)
    o_ref[...] = y


def _gn_scale_kernel(x_ref, g_ref, b_ref, mask_ref, emb_ref, ew_ref, eb_ref, o_ref,
                     *, groups, eps, silu):
    """GroupNorm -> *(1 + SiLU(emb) @ W + b) -> optional SiLU, emb linear fused in-kernel."""
    x = x_ref[...]                                              # (B, T, C)
    B = x.shape[0]
    y = _group_normalize(x, mask_ref, groups, eps) * g_ref[...] + b_ref[...]
    e = emb_ref[...]
    e = e * jax.nn.sigmoid(e)                                   # SiLU before the linear
    s2 = jnp.dot(e.astype(jnp.bfloat16), ew_ref[...].astype(jnp.bfloat16),
                 preferred_element_type=jnp.float32) + eb_ref[...]          # (B, C)
    rows = [s2[bi:bi + 1, :][None] for bi in range(B)]          # each (1, 1, C)
    s = jnp.concatenate(rows, axis=0)                           # (B, 1, C)
    y = y * (1.0 + s)
    if silu:
        y = y * jax.nn.sigmoid(y)
    o_ref[...] = y


def _attn_kernel(x_ref, g_ref, b_ref, mask_ref,
                 wq_ref, bq_ref, wk_ref, bk_ref, wv_ref, bv_ref,
                 wp_ref, bp_ref, o_ref, *, groups, eps):
    """Fused AttentionBlock: GN + QKV + legacy attention + proj + residual (one batch/step)."""
    x = x_ref[0]                                                # (T, C)
    C = x.shape[1]
    xn = _group_normalize(x, mask_ref, groups, eps) * g_ref[...] + b_ref[...]
    xb = xn.astype(jnp.bfloat16)
    q = jnp.dot(xb, wq_ref[...].astype(jnp.bfloat16),
                preferred_element_type=jnp.float32) + bq_ref[...]
    k = jnp.dot(xb, wk_ref[...].astype(jnp.bfloat16),
                preferred_element_type=jnp.float32) + bk_ref[...]
    v = jnp.dot(xb, wv_ref[...].astype(jnp.bfloat16),
                preferred_element_type=jnp.float32) + bv_ref[...]
    scale = 1.0 / math.sqrt(math.sqrt(C))
    att = jax.lax.dot_general((q * scale).astype(jnp.bfloat16),
                              (k * scale).astype(jnp.bfloat16),
                              (((1,), (1,)), ((), ())),
                              preferred_element_type=jnp.float32)           # (T, T)
    att = att - jnp.max(att, axis=-1, keepdims=True)
    att = jnp.exp(att)
    att = att * pl.reciprocal(jnp.sum(att, axis=-1, keepdims=True), approx=True)
    a = jnp.dot(att.astype(jnp.bfloat16), v.astype(jnp.bfloat16),
                preferred_element_type=jnp.float32)                          # (T, C)
    h = jnp.dot(a.astype(jnp.bfloat16), wp_ref[...].astype(jnp.bfloat16),
                preferred_element_type=jnp.float32) + bp_ref[...]
    o_ref[0] = x + h


def _linear_kernel(x_ref, w_ref, b_ref, o_ref, *, pre_silu, post_silu):
    x = x_ref[...]
    if pre_silu:
        x = x * jax.nn.sigmoid(x)
    y = jnp.dot(x.astype(jnp.bfloat16), w_ref[...].astype(jnp.bfloat16),
                preferred_element_type=jnp.float32) + b_ref[...]
    if post_silu:
        y = y * jax.nn.sigmoid(y)
    o_ref[...] = y


def _mlp_kernel(x_ref, w1_ref, b1_ref, w2_ref, b2_ref, o_ref):
    """linear -> SiLU -> linear (time/pos embedding MLP)."""
    x = x_ref[...]
    h = jnp.dot(x.astype(jnp.bfloat16), w1_ref[...].astype(jnp.bfloat16),
                preferred_element_type=jnp.float32) + b1_ref[...]
    h = h * jax.nn.sigmoid(h)
    o_ref[...] = jnp.dot(h.astype(jnp.bfloat16), w2_ref[...].astype(jnp.bfloat16),
                         preferred_element_type=jnp.float32) + b2_ref[...]


# ----------------------------------------------------------------------------------
# Cached pallas_call builders
# ----------------------------------------------------------------------------------


def _pick_tb(N, H, W):
    """Images per grid step: divide N, keep the row dim a multiple of 8, prefer >=2 steps."""
    unit = (H + 2) * (W + 2)
    valid = [t for t in range(1, min(N, 8) + 1) if N % t == 0 and (t * unit) % 8 == 0]
    if not valid:
        return N
    multi = [t for t in valid if N // t >= 2]
    return max(multi) if multi else max(valid)


@functools.lru_cache(maxsize=None)
def _conv_call(N, H, W, Cin, Cout, pre_silu):
    TB = _pick_tb(N, H, W)
    unit = (H + 2) * (W + 2)
    R = TB * unit
    kern = functools.partial(_conv3x3_kernel, W=W, pre_silu=pre_silu)
    return jax.jit(pl.pallas_call(
        kern,
        out_shape=jax.ShapeDtypeStruct((N * unit, Cout), jnp.float32),
        grid=(N // TB,),
        in_specs=[
            pl.BlockSpec((R, Cin), lambda i: (i, 0)),
            pl.BlockSpec((3, 3, Cin, Cout), lambda i: (0, 0, 0, 0)),
            pl.BlockSpec((1, Cout), lambda i: (0, 0)),
        ],
        out_specs=pl.BlockSpec((R, Cout), lambda i: (i, 0)),
        compiler_params=_PARALLEL,
    ))


@functools.lru_cache(maxsize=None)
def _gn_call(B, T, C, groups, silu, scaled):
    if scaled:
        kern = functools.partial(_gn_scale_kernel, groups=groups, eps=1e-5, silu=silu)
    else:
        kern = functools.partial(_gn_kernel, groups=groups, eps=1e-5, silu=silu)
    return jax.jit(pl.pallas_call(
        kern, out_shape=jax.ShapeDtypeStruct((B, T, C), jnp.float32)))


@functools.lru_cache(maxsize=None)
def _attn_call(B, T, C, groups):
    kern = functools.partial(_attn_kernel, groups=groups, eps=1e-5)
    full2 = lambda n: (0, 0)
    return jax.jit(pl.pallas_call(
        kern,
        out_shape=jax.ShapeDtypeStruct((B, T, C), jnp.float32),
        grid=(B,),
        in_specs=[
            pl.BlockSpec((1, T, C), lambda n: (n, 0, 0)),
            pl.BlockSpec((1, C), full2),
            pl.BlockSpec((1, C), full2),
            pl.BlockSpec((groups, 1, C), lambda n: (0, 0, 0)),
            pl.BlockSpec((C, C), full2),
            pl.BlockSpec((1, C), full2),
            pl.BlockSpec((C, C), full2),
            pl.BlockSpec((1, C), full2),
            pl.BlockSpec((C, C), full2),
            pl.BlockSpec((1, C), full2),
            pl.BlockSpec((C, C), full2),
            pl.BlockSpec((1, C), full2),
        ],
        out_specs=pl.BlockSpec((1, T, C), lambda n: (n, 0, 0)),
        compiler_params=_PARALLEL,
    ))


@functools.lru_cache(maxsize=None)
def _linear_call(M, K, N, pre_silu, post_silu):
    kern = functools.partial(_linear_kernel, pre_silu=pre_silu, post_silu=post_silu)
    return jax.jit(pl.pallas_call(
        kern, out_shape=jax.ShapeDtypeStruct((M, N), jnp.float32)))


@functools.lru_cache(maxsize=None)
def _mlp_call(M, N):
    return jax.jit(pl.pallas_call(
        _mlp_kernel, out_shape=jax.ShapeDtypeStruct((M, N), jnp.float32)))


@functools.lru_cache(maxsize=None)
def _group_masks(C, groups, extra_dims):
    gid = np.arange(C) // (C // groups)
    m = (gid[None, :] == np.arange(groups)[:, None]).astype(np.float32)   # (G, C)
    shape = (groups,) + (1,) * extra_dims + (C,)
    return jnp.asarray(m.reshape(shape))


# ----------------------------------------------------------------------------------
# JAX-level op wrappers (glue around the Pallas kernels).  Activations are channels-last.
# ----------------------------------------------------------------------------------


def linear(x, w, b, pre_silu=False, post_silu=False):
    M, K = x.shape
    N = w.shape[1]
    return _linear_call(M, K, N, bool(pre_silu), bool(post_silu))(x, w, b.reshape(1, N))


def mlp2(x, w1, b1, w2, b2):
    M = x.shape[0]
    N = w2.shape[1]
    return _mlp_call(M, N)(x, w1, b1.reshape(1, -1), w2, b2.reshape(1, -1))


def conv3d_133(x, w, b, pre_silu=False):
    """Conv3d kernel (1,3,3), padding (0,1,1).  x: (B, Z, H, W, Cin), w: (3,3,Cin,Cout)."""
    B, Z, H, W, Cin = x.shape
    Cout = w.shape[-1]
    N = B * Z
    xp = jnp.pad(x.reshape(N, H, W, Cin), ((0, 0), (1, 1), (1, 1), (0, 0)))
    x2 = xp.reshape(N * (H + 2) * (W + 2), Cin)
    yf = _conv_call(N, H, W, Cin, Cout, bool(pre_silu))(x2, w, b.reshape(1, Cout))
    y = yf.reshape(N, H + 2, W + 2, Cout)[:, :H, :W, :]
    return y.reshape(B, Z, H, W, Cout)


def conv3d_k33(x, w, b, pre_silu=False):
    """Conv3d kernel (kz,3,3), padding (0,1,1): z-taps folded onto the channel axis."""
    kz, _, _, Cin, Cout = w.shape
    Zo = x.shape[1] - (kz - 1)
    xs = jnp.concatenate([x[:, dz:dz + Zo] for dz in range(kz)], axis=-1)
    w2 = jnp.transpose(w, (1, 2, 0, 3, 4)).reshape(3, 3, kz * Cin, Cout)
    return conv3d_133(xs, w2, b, pre_silu=pre_silu)


def conv1x1(x, w, b):
    """Conv3d kernel 1 == per-voxel channel matmul."""
    sh = x.shape
    y = linear(x.reshape(-1, sh[-1]), w, b)
    return y.reshape(sh[:-1] + (w.shape[1],))


def group_norm(x, gamma, beta, emb_pack=None, silu=True, groups=4):
    """GroupNorm -> *(1 + SiLU(emb)@W + b) -> optional SiLU.  x: (B, ..., C) channels-last."""
    B, C = x.shape[0], x.shape[-1]
    T = int(np.prod(x.shape[1:-1]))
    xf = x.reshape(B, T, C)
    masks = _group_masks(C, groups, 2)
    g = gamma.reshape(1, 1, C)
    bt = beta.reshape(1, 1, C)
    if emb_pack is None:
        y = _gn_call(B, T, C, groups, bool(silu), False)(xf, g, bt, masks)
    else:
        emb, ew, eb = emb_pack
        y = _gn_call(B, T, C, groups, bool(silu), True)(
            xf, g, bt, masks, emb, ew, eb.reshape(1, C))
    return y.reshape(x.shape)


def attention_fwd(p, h, G):
    """AttentionBlock (single head, legacy QKV order) over flattened (z, h, w)."""
    # TODO(synk): the custom z_size / is_half arguments of this codebase's AttentionBlock are
    # unavailable; standard diffae attention over the flattened spatial axis is used.
    B, C = h.shape[0], h.shape[-1]
    T = int(np.prod(h.shape[1:-1]))
    xf = h.reshape(B, T, C)
    masks = _group_masks(C, G, 1)
    qw, qb = p['qkv_w'], p['qkv_b']
    y = _attn_call(B, T, C, G)(
        xf, p['norm_gamma'].reshape(1, C), p['norm_beta'].reshape(1, C), masks,
        qw[:, :C], qb[:C].reshape(1, C),
        qw[:, C:2 * C], qb[C:2 * C].reshape(1, C),
        qw[:, 2 * C:], qb[2 * C:].reshape(1, C),
        p['proj_w'], p['proj_b'].reshape(1, C))
    return y.reshape(h.shape)


def upsample_nn(x):
    """Upsample (dims=3, use_conv=False): nearest x2 in H and W only."""
    x = jnp.repeat(x, 2, axis=2)
    return jnp.repeat(x, 2, axis=3)


def avgpool_hw(x):
    """Downsample (dims=3, use_conv=False): AvgPool3d kernel/stride (1,2,2)."""
    B, Z, H, W, C = x.shape
    return x.reshape(B, Z, H // 2, 2, W // 2, 2, C).mean(axis=(3, 5))


def timestep_embedding(timesteps, dim, max_period=10000):
    half = dim // 2
    freqs = jnp.exp(-math.log(max_period) * jnp.arange(half, dtype=jnp.float32) / half)
    args = timesteps.astype(jnp.float32)[:, None] * freqs[None, :]
    emb = jnp.concatenate([jnp.cos(args), jnp.sin(args)], axis=-1)
    if dim % 2:
        emb = jnp.concatenate([emb, jnp.zeros_like(emb[:, :1])], axis=-1)
    return emb


def to_collage(h, half_p, p1, p2, hei, wid):
    """'(b p1 p2) c z h w -> b c z (p1 h) (p2 w)' -> center crop -> back to tiles (channels-last)."""
    bt, z, hh, ww, c = h.shape
    b = bt // (p1 * p2)
    h = h.reshape(b, p1, p2, z, hh, ww, c)
    h = jnp.transpose(h, (0, 3, 1, 4, 2, 5, 6)).reshape(b, z, p1 * hh, p2 * ww, c)
    h = h[:, :, half_p:-half_p, half_p:-half_p, :]
    Hc, Wc = h.shape[2], h.shape[3]
    q1, q2 = Hc // hei, Wc // wid
    h = h.reshape(b, z, q1, hei, q2, wid, c)
    return jnp.transpose(h, (0, 2, 4, 1, 3, 5, 6)).reshape(b * q1 * q2, z, hei, wid, c)


# ----------------------------------------------------------------------------------
# Module-level blocks
# ----------------------------------------------------------------------------------


def resblock_fwd(p, kw, h, emb, G):
    """BeatGANs ResBlock (scale-only conditioning, kernel (1,3,3))."""
    # TODO(synk): cond_emb_layers (two_cond) is not applied -- in this patch_dm variant the
    # `cond` passed to output ResBlocks is a spatial rna tensor that is already channel-concatenated.
    x = h
    h = group_norm(h, p['in_gamma'], p['in_beta'], silu=True, groups=G)
    if kw.get('up'):
        h = upsample_nn(h)
        x = upsample_nn(x)
    elif kw.get('down'):
        h = avgpool_hw(h)
        x = avgpool_hw(x)
    h = conv3d_133(h, p['in_w'], p['in_b'])
    h = group_norm(h, p['out_gamma'], p['out_beta'],
                   emb_pack=(emb, p['emb_w'], p['emb_b']), silu=True, groups=G)
    h = conv3d_133(h, p['out_w'], p['out_b'])
    if 'skip_w' in p:
        x = conv1x1(x, p['skip_w'], p['skip_b'])
    return x + h


def run_block(layers, h, emb, G):
    for kind, p, kw in layers:
        if kind == 'conv':
            h = conv3d_133(h, p['w'], p['b'])
        elif kind == 'res':
            h = resblock_fwd(p, kw, h, emb, G)
        else:  # 'attn'
            h = attention_fwd(p, h, G)
    return h


def time_style_fwd(p, t_emb, pos_emb):
    te = mlp2(t_emb, p['time_w1'], p['time_b1'], p['time_w2'], p['time_b2'])
    pe = mlp2(pos_emb, p['pos_w1'], p['pos_b1'], p['pos_w2'], p['pos_b2'])
    return jnp.concatenate([te, pe], axis=1)


def rna_fwd(model, rna_h):
    G = model['G']
    p0 = model['rna_blocks'][0]
    h = attention_fwd(p0['attn'], rna_h, G)
    h = conv3d_k33(h, p0['conv_w'], p0['conv_b'])
    h = upsample_nn(h)
    outs = [h]
    for rid in range(1, 4):
        p = model['rna_blocks'][rid]
        h = conv3d_133(h, p['conv_w'], p['conv_b'], pre_silu=True)   # SiLU fused into conv
        h = upsample_nn(h)
        outs.append(h)
    return outs


def out_fwd(p, h, G):
    h = group_norm(h, p['gamma'], p['beta'], silu=True, groups=G)
    return conv3d_133(h, p['w'], p['b'])


# ----------------------------------------------------------------------------------
# Deterministic parameter construction (mirrors BeatGANsUNetModel.__init__)
# ----------------------------------------------------------------------------------


class ParamGen:
    def __init__(self, seed=0):
        self._key = jax.random.PRNGKey(seed)
        self._i = 0

    def _next(self, shape, scale):
        self._i += 1
        k = jax.random.fold_in(self._key, self._i)
        return jax.random.normal(k, shape, dtype=jnp.float32) * scale

    def w(self, shape, scale=None):
        fan_in = int(np.prod(shape[:-1]))
        if scale is None:
            scale = 1.0 / math.sqrt(max(1, fan_in))
        return self._next(shape, scale)

    def conv_w(self, cin, cout, scale=None):
        return self.w((3, 3, cin, cout), scale)

    def conv_w3(self, cin, cout, kz, scale=None):
        return self.w((kz, 3, 3, cin, cout), scale)

    def b(self, n):
        return jnp.zeros((n,), jnp.float32)


def build_model(cfg, gen):
    # TODO(synk): `normalization()` source unavailable -- GroupNorm with gn_sz(=4) groups is used.
    # TODO(synk): `zero_module` convs are given small non-zero synthetic weights so the compute
    # path is numerically exercised (weights are synthetic, not a checkpoint).
    z_size = math.ceil(len(cfg['rna_tpl']) / 2)
    in_chn = cfg['in_channels'] // z_size
    mc = cfg['model_channels']
    emb_ch = cfg['embed_channels']
    cm = cfg['channel_mult']
    G = cfg['gn_groups']

    half = emb_ch // 2
    time_embed = dict(
        time_w1=gen.w((mc, half)), time_b1=gen.b(half),
        time_w2=gen.w((half, half)), time_b2=gen.b(half),
        pos_w1=gen.w((128, half)), pos_b1=gen.b(half),
        pos_w2=gen.w((half, half)), pos_b2=gen.b(half))

    def res_p(cin, cout, up=False, down=False):
        p = dict(
            in_gamma=jnp.ones((cin,), jnp.float32), in_beta=jnp.zeros((cin,), jnp.float32),
            in_w=gen.conv_w(cin, cout), in_b=gen.b(cout),
            emb_w=gen.w((emb_ch, cout)), emb_b=gen.b(cout),
            out_gamma=jnp.ones((cout,), jnp.float32), out_beta=jnp.zeros((cout,), jnp.float32),
            out_w=gen.conv_w(cout, cout, scale=0.02), out_b=gen.b(cout))
        if cin != cout:
            p['skip_w'] = gen.w((cin, cout))
            p['skip_b'] = gen.b(cout)
        return ('res', p, dict(up=up, down=down))

    def attn_p(ch):
        return ('attn', dict(
            norm_gamma=jnp.ones((ch,), jnp.float32), norm_beta=jnp.zeros((ch,), jnp.float32),
            qkv_w=gen.w((ch, 3 * ch)), qkv_b=gen.b(3 * ch),
            proj_w=gen.w((ch, ch), scale=0.02), proj_b=gen.b(ch)), {})

    ch = input_ch = int(cm[0] * mc)
    input_blocks = [[('conv', dict(w=gen.conv_w(in_chn, ch), b=gen.b(ch)), {})]]
    chans = [[] for _ in cm]
    chans[0].append(ch)
    input_num_blocks = [0] * len(cm)
    input_num_blocks[0] = 1
    resolution = cfg['image_size']
    for level, mult in enumerate(cm):
        for _ in range(cfg['num_res_blocks']):
            layers = [res_p(ch, int(mult * mc))]
            ch = int(mult * mc)
            if resolution in cfg['attention_resolutions']:
                layers.append(attn_p(ch))
            input_blocks.append(layers)
            chans[level].append(ch)
            input_num_blocks[level] += 1
        if level != len(cm) - 1:
            resolution //= 2
            input_blocks.append([res_p(ch, ch, down=True)])
            chans[level + 1].append(ch)
            input_num_blocks[level + 1] += 1

    middle = [res_p(ch, ch), attn_p(ch), res_p(ch, ch)]

    rn = cfg['rna_num']
    ichs = [rn, rn, 128, 64]
    ochs = [rn, 128, 64, 32]
    ker = {1: 1, 4: 3, 8: 5, 16: 9}[len(cfg['rna_tpl'])]
    rna_blocks = [dict(attn=attn_p(ichs[0])[1],
                       conv_w=gen.conv_w3(ichs[0], ochs[0], ker), conv_b=gen.b(ochs[0]))]
    for rid in range(1, 4):
        rna_blocks.append(dict(conv_w=gen.conv_w(ichs[rid], ochs[rid]), conv_b=gen.b(ochs[rid])))

    output_blocks = []
    output_num_blocks = [0] * len(cm)
    for level, mult in list(enumerate(cm))[::-1]:
        rdch = ochs[len(ochs) - 1 - level]
        for i in range(cfg['num_res_blocks'] + 1):
            ich = chans[level].pop() if chans[level] else 0
            layers = [res_p(ch + ich + rdch, int(mc * mult))]
            ch = int(mc * mult)
            if resolution in cfg['attention_resolutions']:
                layers.append(attn_p(ch))
            if level and i == cfg['num_res_blocks']:
                resolution *= 2
                layers.append(res_p(ch, ch, up=True))
            output_blocks.append(layers)
            output_num_blocks[level] += 1

    out_head = dict(gamma=jnp.ones((ch,), jnp.float32), beta=jnp.zeros((ch,), jnp.float32),
                    w=gen.conv_w(input_ch, in_chn), b=gen.b(in_chn))

    return dict(z_size=z_size, in_chn=in_chn, ker=ker, G=G,
                time_embed=time_embed,
                input_blocks=input_blocks, input_num_blocks=input_num_blocks,
                middle=middle, rna_blocks=rna_blocks,
                output_blocks=output_blocks, output_num_blocks=output_num_blocks,
                out=out_head)


# ----------------------------------------------------------------------------------
# Forward pass (mirrors BeatGANsUNetModel.forward, do_train=False, dropout in eval mode)
# ----------------------------------------------------------------------------------


def _vxl2pxl(p):
    """'b s z h w -> b (s z) h w' from channels-last (b, z, h, w, s)."""
    b, z, hh, ww, s = p.shape
    return jnp.transpose(p, (0, 4, 1, 2, 3)).reshape(b, s * z, hh, ww)


def unet_forward(model, cfg, x, t, rna, pos, imgs, patch_size, do_train=False):
    # TODO(synk): dropout layers are omitted (eval-mode identity); sparse-COO rna input path,
    # pos_random classifier-free masking and class conditioning (num_classes) are not exercised.
    G = model['G']
    z_size = model['z_size']
    H_img, W_img = imgs.shape[-2], imgs.shape[-1]
    pnx, pny = H_img // patch_size, W_img // patch_size
    B = x.shape[0]
    t0 = t.shape[0]

    t_cur = jnp.repeat(t, B // t0)
    t_emb = timestep_embedding(t_cur, cfg['model_channels'])
    pos_emb = jnp.concatenate([timestep_embedding(pos[:, 0], 64),
                               timestep_embedding(pos[:, 1], 64)], axis=1)
    emb = time_style_fwd(model['time_embed'], t_emb, pos_emb)

    # "Additional embedding" (inference grid positions)
    gx = jnp.linspace(0.5, pnx - 0.5, pnx)
    gy = jnp.linspace(0.5, pny - 0.5, pny)
    xx, yy = jnp.meshgrid(gx, gy, indexing='ij')
    pos_new = jnp.tile(jnp.stack([xx, yy], axis=-1).reshape(-1, 2), (t0, 1))
    pos_emb_new = jnp.concatenate([timestep_embedding(pos_new[:, 0], 64),
                                   timestep_embedding(pos_new[:, 1], 64)], axis=1)
    t_cur_new = jnp.repeat(t, pos_new.shape[0] // t0)
    t_emb_new = timestep_embedding(t_cur_new, cfg['model_channels'])
    emb_new = time_style_fwd(model['time_embed'], t_emb_new, pos_emb_new)

    # rna: 'b h w (z g) -> b g z h w'  -> channels-last (b, z, h, w, g)
    g = cfg['rna_num']
    br, hr, wr, zg = rna.shape
    rna_h = jnp.transpose(rna.reshape(br, hr, wr, zg // g, g), (0, 3, 1, 2, 4))
    rna_l = rna_fwd(model, rna_h)

    # x: 'b (s z) h w -> b s z h w' -> channels-last (b, z, h, w, s)
    h = jnp.transpose(
        x.reshape(B, model['in_chn'], z_size, x.shape[-2], x.shape[-1]),
        (0, 2, 3, 4, 1)).astype(jnp.float32)

    hs = [[] for _ in cfg['channel_mult']]
    k = 0
    for i in range(len(model['input_num_blocks'])):
        for _ in range(model['input_num_blocks'][i]):
            h = run_block(model['input_blocks'][k], h, emb, G)
            hs[i].append(h)
            k += 1
    h = run_block(model['middle'], h, emb, G)
    h_train = h

    p1 = 2 if do_train else pnx + 1
    p2 = 2 if do_train else pny + 1
    onb = model['output_num_blocks']

    # ---- pred1 path: collaged features, new position embedding ----
    hs1 = [list(l) for l in hs]
    hh = h
    k = 0
    for i in range(len(onb)):
        hei, wid = hh.shape[2], hh.shape[3]
        half_p = hei // 2
        if i == 0:
            hh = to_collage(hh, half_p, p1, p2, hei, wid)
        rna_i = to_collage(rna_l[i], half_p, p1, p2, hei, wid)
        for _ in range(onb[i]):
            lateral = to_collage(hs1[-i - 1].pop(), half_p, p1, p2, hei, wid)
            hh = jnp.concatenate([hh, lateral, rna_i], axis=-1)
            hh = run_block(model['output_blocks'][k], hh, emb_new, G)
            k += 1
    pred1 = _vxl2pxl(out_fwd(model['out'], hh, G))

    # ---- pred2 path: un-collaged features, original embedding ----
    hs2 = [list(l) for l in hs]
    ht = h_train
    k = 0
    for i in range(len(onb)):
        for _ in range(onb[i]):
            lateral = hs2[-i - 1].pop()
            ht = jnp.concatenate([ht, lateral, rna_l[i]], axis=-1)
            ht = run_block(model['output_blocks'][k], ht, emb, G)
            k += 1
    pred2 = _vxl2pxl(out_fwd(model['out'], ht, G))

    return pred1, pred2


# ----------------------------------------------------------------------------------
# Main
# ----------------------------------------------------------------------------------


if __name__ == "__main__":
    cfg = dict(
        image_size=16,
        in_channels=4,
        model_channels=8,
        rna_tpl=tuple(range(4)),      # z_size = 2, rna conv z-kernel = 3
        rna_num=8,
        num_res_blocks=1,
        embed_channels=32,
        attention_resolutions=(2,),
        channel_mult=(1, 2, 4, 8),
        gn_groups=4,                  # conf.gn_sz
    )

    gen = ParamGen(0)
    model = build_model(cfg, gen)

    key = jax.random.PRNGKey(0)
    k1, k2 = jax.random.split(key, 2)

    patch_size = 16
    # imgs (only its H, W are used) -> patch_num_x = patch_num_y = 1
    imgs = jnp.zeros((1, 3, 16, 16), jnp.float32)
    t = jnp.array([13.0], jnp.float32)                       # one diffusion timestep
    # batch = t * (patch_num_x + 1) * (patch_num_y + 1) = 4 patches
    x = jax.random.normal(k1, (4, cfg['in_channels'], 16, 16), jnp.float32)
    # rna: 'b h w (z g)' with z = len(rna_tpl)=4, g = rna_num=8, spatial = image_size/16 = 1
    rna = jax.random.normal(k2, (4, 1, 1, len(cfg['rna_tpl']) * cfg['rna_num']), jnp.float32)
    pos = jnp.array([[0.5, 0.5], [0.5, 1.5], [1.5, 0.5], [1.5, 1.5]], jnp.float32)

    pred1, pred2 = unet_forward(model, cfg, x, t, rna, pos, imgs, patch_size, do_train=False)
    jax.block_until_ready((pred1, pred2))

    assert pred1.shape == (1, 4, 16, 16), pred1.shape
    assert pred2.shape == (4, 4, 16, 16), pred2.shape
    assert bool(jnp.all(jnp.isfinite(pred1))) and bool(jnp.all(jnp.isfinite(pred2)))
    print("KERNEL_OK")
</pallas_src>

<mosaic_0001>
module attributes {stable_mosaic.version = 11 : i64} {
  func.func @_mlp_kernel(%arg0: memref<4x8xf32, #tpu.memory_space<vmem>>, %arg1: memref<8x16xf32, #tpu.memory_space<vmem>>, %arg2: memref<1x16xf32, #tpu.memory_space<vmem>>, %arg3: memref<16x16xf32, #tpu.memory_space<vmem>>, %arg4: memref<1x16xf32, #tpu.memory_space<vmem>>, %arg5: memref<4x16xf32, #tpu.memory_space<vmem>>) attributes {dimension_semantics = [], scalar_prefetch = 0 : i64, scratch_operands = 0 : i64, tpu.core_type = #tpu.core_type<tc>} {
    %c0 = arith.constant 0 : index
    %c0_0 = arith.constant 0 : index
    %0 = vector.load %arg0[%c0, %c0_0] : memref<4x8xf32, #tpu.memory_space<vmem>>, vector<4x8xf32>
    %1 = arith.truncf %0 : vector<4x8xf32> to vector<4x8xbf16>
    %c0_1 = arith.constant 0 : index
    %c0_2 = arith.constant 0 : index
    %2 = vector.load %arg1[%c0_1, %c0_2] : memref<8x16xf32, #tpu.memory_space<vmem>>, vector<8x16xf32>
    %3 = arith.truncf %2 : vector<8x16xf32> to vector<8x16xbf16>
    %cst = arith.constant dense<0.000000e+00> : vector<4x16xf32>
    %4 = tpu.matmul %1, %3, %cst {dimension_numbers = #tpu.dot_dimension_numbers<[1], [0], [0], [1], [0, 0, 1, 1], [], []>} : vector<4x8xbf16>, vector<8x16xbf16>, vector<4x16xf32> -> vector<4x16xf32>
    %c0_3 = arith.constant 0 : index
    %c0_4 = arith.constant 0 : index
    %5 = vector.load %arg2[%c0_3, %c0_4] : memref<1x16xf32, #tpu.memory_space<vmem>>, vector<1x16xf32>
    %6 = vector.broadcast %5 : vector<1x16xf32> to vector<4x16xf32>
    %7 = arith.addf %4, %6 : vector<4x16xf32>
    %8 = arith.negf %7 : vector<4x16xf32>
    %9 = math.exp %8 : vector<4x16xf32>
    %cst_5 = arith.constant 1.000000e+00 : f32
    %10 = vector.broadcast %cst_5 : f32 to vector<4x16xf32>
    %11 = arith.addf %10, %9 : vector<4x16xf32>
    %12 = arith.divf %10, %11 : vector<4x16xf32>
    %13 = arith.mulf %7, %12 : vector<4x16xf32>
    %14 = arith.truncf %13 : vector<4x16xf32> to vector<4x16xbf16>
    %c0_6 = arith.constant 0 : index
    %c0_7 = arith.constant 0 : index
    %15 = vector.load %arg3[%c0_6, %c0_7] : memref<16x16xf32, #tpu.memory_space<vmem>>, vector<16x16xf32>
    %16 = arith.truncf %15 : vector<16x16xf32> to vector<16x16xbf16>
    %cst_8 = arith.constant dense<0.000000e+00> : vector<4x16xf32>
    %17 = tpu.matmul %14, %16, %cst_8 {dimension_numbers = #tpu.dot_dimension_numbers<[1], [0], [0], [1], [0, 0, 1, 1], [], []>} : vector<4x16xbf16>, vector<16x16xbf16>, vector<4x16xf32> -> vector<4x16xf32>
    %c0_9 = arith.constant 0 : index
    %c0_10 = arith.constant 0 : index
    %18 = vector.load %arg4[%c0_9, %c0_10] : memref<1x16xf32, #tpu.memory_space<vmem>>, vector<1x16xf32>
    %19 = vector.broadcast %18 : vector<1x16xf32> to vector<4x16xf32>
    %20 = arith.addf %17, %19 : vector<4x16xf32>
    %c0_11 = arith.constant 0 : index
    %c0_12 = arith.constant 0 : index
    %21 = vector.load %arg5[%c0_11, %c0_12] : memref<4x16xf32, #tpu.memory_space<vmem>>, vector<4x16xf32>
    tpu.vector_store %arg5[%c0_11, %c0_12], %20 {strides = array<i32>} : memref<4x16xf32, #tpu.memory_space<vmem>>, vector<4x16xf32>,
    return
  }
}

</mosaic_0001>

<bundles_post_ra>
// kernel: tpu_custom_call.1
= control target key start
LH: loop header
LB: loop body
LE: loop exit
PB: predicated region body
PF: predicated region fallthrough
CT: control target
= control target key end

     0   :  { %10 = vsyncpa [#allocation3], 0  ;;  %s330_s0 = inlined_call_operand.hbm [shape: f32[4,8], index: 0, kind: input, shape index: {}]   ;;  %s331_s1 = inlined_call_operand.hbm [shape: f32[8,16], index: 1, kind: input, shape index: {}]   ;;  %s332_s2 = inlined_call_operand.vmem [shape: f32[1,16], index: 2, kind: input, shape index: {}]   ;;  %s333_s3 = inlined_call_operand.hbm [shape: f32[16,16], index: 3, kind: input, shape index: {}]   ;;  %s334_s4 = inlined_call_operand.vmem [shape: f32[1,16], index: 4, kind: input, shape index: {}]   ;;  %s335_s5 = inlined_call_operand.hbm [shape: f32[4,16], index: 5, kind: output, shape index: {}]  }
   0x1   :  { %11 = vsyncpa [#allocation6], 0  ;;  %s29_s20 = sshll.u32 %s331_s1, 4  ;;  %s30_s20 = int_to_ptr.hbm [resolvable:$true] %s29_s20 }
   0x2   :  { %12 = vsyncpa [#allocation4], 0  ;;  %s276_s21 = smov [#allocation5]   ;;  %s18_s25 = sshll.u32 %s330_s0, 4  ;;  %s19_s25 = int_to_ptr.hbm [resolvable:$true] %s18_s25 }
   0x3   :  { %s31_s22 = sshll.u32 %s276_s21, 4  ;;  %s277_s26 = smov [#allocation2]   ;;  %s32_s22 = int_to_ptr.vmem [resolvable:$true] %s31_s22 }
   0x4   :  { %34 = dma.hbm_to_vmem [thread:$0]  %s30_s20, 128, %s32_s22, [#allocation6]  }
   0x5   :  { %s20_s27 = sshll.u32 %s277_s26, 4  ;;  %s41_s30 = sshll.u32 %s333_s3, 4  ;;  %s21_s27 = int_to_ptr.vmem [resolvable:$true] %s20_s27  ;;  %s42_s30 = int_to_ptr.hbm [resolvable:$true] %s41_s30 }
   0x6   :  { %23 = dma.hbm_to_vmem [thread:$0]  %s19_s25, 64, %s21_s27, [#allocation3]  }
   0x7   :  { %s278_s1 = smov [#allocation7]   ;;  %s279_s7 = smov 128  }
   0x8   :  { %s43_s6 = sshll.u32 %s278_s1, 4  ;;  %s280_s8 = smov 8   ;;  %s44_s6 = int_to_ptr.vmem [resolvable:$true] %s43_s6 }
   0x9   :  { %49 = dma.hbm_to_vmem [thread:$0]  %s42_s30, 256, %s44_s6, [#allocation6], %s279_s7, %s279_s7, %s280_s8  }
   0xa   :  { %270 = dma.done.wait [#allocation3], 64  }
   0xb   :  { %271 = vsyncadd [#allocation3], 4294967232 }
   0xc   :  { %272 = dma.done.wait [#allocation6], 384  }
   0xd   :  { %273 = vsyncadd [#allocation6], 4294966912  ;;  %v67_v0 = vld [vmem:[#allocation5] sm:$0xff]  ;;  %vm77_vm0 = vcmask 1043456   ;;  %v65_v1 = vld [vmem:[#allocation2] sm:$0xf] }
   0xe   :  { %v68_v2 = vpack.c.bf16 %v67_v0, %v67_v0  ;;  %v66_v4 = vpack.c.bf16 %v65_v1, %v65_v1  ;;  %vm73_vm1 = vcmask 64512   ;;  %v168_v5 = vld [vmem:[%s332_s2] ss:$0 sm:$0xff]  ;;  %v115_v6 = vld [vmem:[#allocation7] sm:$0xff]  ;;  %v116_v7 = vld [vmem:[#allocation7 + $0x8] sm:$0xff]  ;;  %vm122_vm6 = vcmask 130048  }
   0xf   :  { %v117_v8 = vpack.c.bf16 %v116_v7, %v115_v6  ;;  %v169_v27 = vld [vmem:[%s334_s4] ss:$0 sm:$0xff]  ;;  %s281_s10 = smov [#allocation8]   ;;  %s148_s14 = sshll.u32 %s335_s5, 4  ;;  %vm139_vm7 = vcmask 125952   ;;  %s149_s14 = int_to_ptr.hbm [resolvable:$true] %s148_s14 }
  0x10   :  { %v79_v3 = vsel %vm77_vm0, %v68_v2, 0  ;;  %s146_s11 = sshll.u32 %s281_s10, 4  ;;  %s147_s11 = int_to_ptr.vmem [resolvable:$true] %s146_s11 }
  0x11   :  { %88 = vmatpush.bf16.msra.mxu0 %v79_v3  ;;  %133 = vmatpush.bf16.msra.mxu1 %v117_v8 }
  0x14   :  { %159 = vmatmul.msk.bf16.vlgmr.msra.gmra.mxu0 %vm73_vm1, %v66_v4 }
  0x91   :  { %v90_v9 = vpop.f32.mrf.mxu0 }
  0x92   :  { %v91_v10 = vadd.f32 %v168_v5, %v90_v9 }
  0x94   :  { %v160_v11 = vmul.f32 -1.442695, %v91_v10 }
  0x96   :  { %170 = vpow2.f32 %v160_v11 }
  0x99   :  { %v92_v12 = vpop.f32.mrf.mxu0 }
  0x9c   :  { %v171_v13 = vpop.eup %170 }
  0x9d   :  { %v97_v14 = vadd.f32 1.0, %v171_v13 }
  0x9f   :  { %172 = vrcp.f32 %v97_v14  ;;  %v109_v18 = vand.u32 2147483648, %v97_v14  ;;  %v107_v20 = vand.u32 2147483647, %v97_v14  ;;  %vm103_vm3 = vweird.f32 %v97_v14 }
  0xa1   :  { %v110_v22 = vor.u32 1.1754944e-38, %v109_v18  ;;  %vm108_vm5 = vcmp.eq.f32.partialorder %v107_v20, 8.507059e+37 }
  0xa5   :  { %v173_v15 = vpop.eup %172 }
  0xa6   :  { %v99_v16 = vmul.f32 %v173_v15, %v97_v14  ;;  %vm104_vm2 = vweird.f32 %v173_v15 }
  0xa7   :  { %vm105_vm4 = vmor %vm103_vm3, %vm104_vm2 }
  0xa8   :  { %v100_v17 = vsub.f32 1.0, %v99_v16 }
  0xaa   :  { %v101_v19 = vmul.f32 %v173_v15, %v100_v17 }
  0xac   :  { %v102_v21 = vadd.f32 %v173_v15, %v101_v19 }
  0xae   :  { %v106_v23 = vsel %vm105_vm4, %v173_v15, %v102_v21 }
  0xaf   :  { %v111_v24 = vsel %vm108_vm5, %v110_v22, %v106_v23 }
  0xb0   :  { %v113_v25 = vmul.f32 %v111_v24, %v91_v10 }
  0xb2   :  { %v114_v26 = vpack.c.bf16 %v113_v25, %v113_v25 }
  0xb4   :  { %161 = vmatmul.msk.bf16.vlgmr.msra.gmra.mxu1 %vm122_vm6, %v114_v26 }
 0x131   :  { %v135_v28 = vpop.f32.mrf.mxu1 }
 0x132   :  { %v136_v29 = vadd.f32 %v169_v27, %v135_v28 }
 0x134   :  { %140 = vst.msk [vmem:[#allocation8] sm:$0xf] %vm139_vm7, %v136_v29 }
 0x135   :  { %151 = dma.vmem_to_hbm [thread:$0]  %s147_s11, 64, %s149_s14, [#allocation4]  }
 0x139   :  { %v137_v30 = vpop.f32.mrf.mxu1 }
 0x13a   :  { %274 = dma.done.wait [#allocation4], 64  }
 0x13b   :  { %275 = vsyncadd [#allocation4], 4294967232 }
 0x13c   :  { %156 = vsyncpa [#allocation3], 1 }
 0x13d   :  { %157 = vsyncpa [#allocation6], 1 }
 0x13e   :  { %158 = vsyncpa [#allocation4], 1 }

</bundles_post_ra>
